<compile_context>
chip_gen: v5e
topology: v5e:2x2
jax: 0.10.0
libtpu: 0.0.40
codegen_flags: <defaults>
</compile_context>

<pallas_src>
import jax
import jax.numpy as jnp
from jax.experimental import pallas as pl
from jax.experimental.pallas import tpu as pltpu

_MIB = 1024 * 1024


def _round_up(n, m):
    return ((n + m - 1) // m) * m


def _sublane(itemsize):
    # Native sublane packing: 8 rows for 4-byte, 16 for 2-byte, 32 for 1-byte.
    return {4: 8, 2: 16, 1: 32}.get(itemsize, 8)


def _tpu_budgets():
    """Per-generation (target_block_bytes, vmem_limit_cap).

    ~4 MiB seq tiles keep the ~0.35 us per-grid-step overhead <5% even at
    v7x's 3.2 TB/s HBM; the limit cap leaves headroom below physical VMEM
    (64 MiB/TC on v7x -> cap 48 MiB, 128 MiB on v5e/v6e -> cap 64 MiB).
    """
    try:
        cap = int(pltpu.get_tpu_info().vmem_capacity_bytes)
    except Exception:
        cap = 64 * _MIB  # conservative: assume v7x-class per-TC VMEM
    target_block = 4 * _MIB
    cap_limit = min(64 * _MIB, (3 * cap) // 4)
    return target_block, cap_limit


def make_pe_table(d_model: int, max_len: int = 5000, dtype=jnp.float32) -> jnp.ndarray:
    """Sinusoidal positional-encoding table, identical to the PyTorch __init__.

    Build it once at "init" time in the activation dtype (dtype=...) so the
    forward pass never has to cast the full table.
    """
    position = jnp.arange(0, max_len, dtype=jnp.float32)[:, None]            # (L, 1)
    div_term = jnp.exp(
        jnp.arange(0, d_model, 2, dtype=jnp.float32)
        * (-jnp.log(10000.0) / d_model)
    )                                                                         # (ceil(D/2),)
    angles = position * div_term                                              # (L, ceil(D/2))
    pe = jnp.zeros((max_len, d_model), dtype=jnp.float32)
    pe = pe.at[:, 0::2].set(jnp.sin(angles))
    pe = pe.at[:, 1::2].set(jnp.cos(angles[:, : d_model // 2]))
    return pe.astype(dtype)                                                   # (L, D)


def _add_pe_kernel(x_ref, pe_ref, o_ref):
    # (TS, D) + (TS, D).  Any PE dtype mismatch is resolved in-kernel on the
    # VPU (hidden under the DMA) instead of a separate full-table XLA pass.
    o_ref[...] = x_ref[...] + pe_ref[...].astype(x_ref.dtype)


def _pe_add_tiled(x: jnp.ndarray, pe_table: jnp.ndarray, donate_x: bool) -> jnp.ndarray:
    """Tiled (seq-tile, batch) add.  Works for any D (masked stores if D%128!=0;
    the wrapper routes to a lane-dense layout whenever possible)."""
    B, S, D = x.shape
    x_item = x.dtype.itemsize
    pe_item = pe_table.dtype.itemsize
    sub = max(_sublane(x_item), _sublane(pe_item))
    d_pad = _round_up(D, 128)  # real VMEM footprint uses the lane-padded width

    target_block, cap_limit = _tpu_budgets()

    # Sequence-tile size: ~target_block bytes per x block, sublane-aligned.
    row_bytes = d_pad * x_item
    rows = max(sub, (target_block // max(row_bytes, 1)) // sub * sub)
    ts = S if S < sub else min(rows, _round_up(S, sub))
    num_s = pl.cdiv(S, ts)

    # VMEM accounting with padded tiles: 2x x in, 2x out, 2x pe (double-buffered).
    ts_pad = _round_up(ts, sub)
    bx = ts_pad * d_pad * x_item
    bpe = ts_pad * d_pad * pe_item
    need = 4 * bx + 2 * bpe
    vmem_limit = int(min(cap_limit, max(32 * _MIB, 2 * need)))

    return pl.pallas_call(
        _add_pe_kernel,
        out_shape=jax.ShapeDtypeStruct((B, S, D), x.dtype),
        grid_spec=pltpu.PrefetchScalarGridSpec(
            num_scalar_prefetch=0,
            # seq tiles outer, batch inner -> the PE tile's block index is
            # unchanged across the inner batch loop, so it is DMA'd once per
            # seq tile (PE HBM traffic S*D instead of B*S*D).
            grid=(num_s, B),
            in_specs=[
                pl.BlockSpec((None, ts, D), lambda s, b: (b, s, 0)),  # activations
                pl.BlockSpec((ts, D), lambda s, b: (s, 0)),           # PE table tile
            ],
            out_specs=pl.BlockSpec((None, ts, D), lambda s, b: (b, s, 0)),
        ),
        compiler_params=pltpu.CompilerParams(
            # Both axes independent; on v7x megacore this lets the grid shard
            # across the two TensorCores sharing the 3.2 TB/s HBM.
            dimension_semantics=("parallel", "parallel"),
            vmem_limit_bytes=vmem_limit,
        ),
        # x (arg 0) and the output have identical shape/dtype; aliasing them
        # removes the second full B*S*D HBM allocation for callers that donate x.
        input_output_aliases=({0: 0} if donate_x else {}),
    )(x, pe_table)


def positional_encoding_forward(
    x: jnp.ndarray,
    pe_table: jnp.ndarray,
    *,
    dropout_rate: float = 0.1,
    training: bool = False,
    donate_x: bool = False,
) -> jnp.ndarray:
    """x: (B, S, D); pe_table: (max_len, D).  Returns dropout(x + pe[:S])."""
    B, S, D = x.shape
    max_len, d_model = pe_table.shape
    if d_model != D:
        raise ValueError(f"pe_table d_model {d_model} != x d_model {D}")
    if S > max_len:
        raise ValueError(f"sequence length {S} exceeds pe_table max_len {max_len}")
    if training and dropout_rate > 0.0:
        # TODO(synk): training-mode dropout (random mask) not implemented.
        raise NotImplementedError(
            "training-mode dropout not implemented; eval-mode dropout is the identity"
        )

    # Fast path: lane-dense D -> unmasked stores, PE table indexed directly
    # via the BlockSpec (no wrapper-side slice/reshape/cast of the table).
    if D % 128 == 0:
        return _pe_add_tiled(x, pe_table, donate_x)

    # Sublane-dense fallback: fold (S, D) into 128-wide rows so vregs are fully
    # packed and stores unmasked.  The x reshape is a contiguous (bitcast-like)
    # reshape; only the small S*D PE slice is materialized.
    L = S * D
    if L % 128 == 0:
        x3 = x.reshape(B, L // 128, 128)
        pe3 = pe_table[:S, :].reshape(L // 128, 128)
        return _pe_add_tiled(x3, pe3, donate_x).reshape(B, S, D)

    # Rare: neither D nor S*D is a multiple of 128.  Still tiled + pipelined
    # and VMEM-bounded, just with masked (vst.msk) stores on the last dim.
    # TODO(synk): pad d_model to a multiple of 128 at the model level for best perf.
    return _pe_add_tiled(x, pe_table, donate_x)


if __name__ == "__main__":
    key = jax.random.PRNGKey(0)
    k1, k2, k3 = jax.random.split(key, 3)

    # Case 1: lane-dense d_model (multiple of 128) -> tiled (seq, batch) fast path.
    B, S, D = 2, 8, 128
    x1 = jax.random.normal(k1, (B, S, D), dtype=jnp.float32)
    pe1 = make_pe_table(D, max_len=5000, dtype=x1.dtype)
    ref1 = x1 + pe1[:S, :][None, :, :]
    y1 = jax.block_until_ready(positional_encoding_forward(x1, pe1))
    assert jnp.allclose(y1, ref1, atol=1e-6), "mismatch vs reference (lane-dense path)"

    # Case 2: d_model not a multiple of 128, but S*D is -> sublane-dense flat path.
    B2, S2, D2 = 2, 8, 32
    x2 = jax.random.normal(k2, (B2, S2, D2), dtype=jnp.float32)
    pe2 = make_pe_table(D2, max_len=5000, dtype=x2.dtype)
    ref2 = x2 + pe2[:S2, :][None, :, :]
    y2 = jax.block_until_ready(positional_encoding_forward(x2, pe2))
    assert jnp.allclose(y2, ref2, atol=1e-6), "mismatch vs reference (flat path)"

    # Case 3: donated input under jit -> input_output_aliases={0: 0} exercised.
    x3 = jax.random.normal(k3, (B, S, D), dtype=jnp.float32)
    ref3 = x3 + pe1[:S, :][None, :, :]
    fwd_donated = jax.jit(
        lambda xx, pe: positional_encoding_forward(xx, pe, donate_x=True),
        donate_argnums=(0,),
    )
    y3 = jax.block_until_ready(fwd_donated(x3, pe1))
    assert jnp.allclose(y3, ref3, atol=1e-6), "mismatch vs reference (donated path)"

    print("KERNEL_OK")
</pallas_src>

<mosaic_0001>
module attributes {stable_mosaic.version = 11 : i64} {
  func.func @_add_pe_kernel(%arg0: i32, %arg1: i32, %arg2: memref<1x8x128xf32, #tpu.memory_space<vmem>>, %arg3: memref<8x128xf32, #tpu.memory_space<vmem>>, %arg4: memref<1x8x128xf32, #tpu.memory_space<vmem>>) attributes {dimension_semantics = [#tpu.dimension_semantics<parallel>, #tpu.dimension_semantics<parallel>], iteration_bounds = array<i64: 1, 2>, scalar_prefetch = 0 : i64, scratch_operands = 0 : i64, tpu.core_type = #tpu.core_type<tc>, window_params = [{transform_indices = @transform_0, window_bounds = array<i64: 1, 8, 128>}, {transform_indices = @transform_1, window_bounds = array<i64: 8, 128>}, {transform_indices = @transform_2, window_bounds = array<i64: 1, 8, 128>}]} {
    %c0 = arith.constant 0 : index
    %c0_0 = arith.constant 0 : index
    %c0_1 = arith.constant 0 : index
    %0 = vector.load %arg2[%c0, %c0_0, %c0_1] : memref<1x8x128xf32, #tpu.memory_space<vmem>>, vector<1x8x128xf32>
    %1 = vector.shape_cast %0 : vector<1x8x128xf32> to vector<8x128xf32>
    %c0_2 = arith.constant 0 : index
    %c0_3 = arith.constant 0 : index
    %2 = vector.load %arg3[%c0_2, %c0_3] : memref<8x128xf32, #tpu.memory_space<vmem>>, vector<8x128xf32>
    %3 = arith.addf %1, %2 : vector<8x128xf32>
    %c0_4 = arith.constant 0 : index
    %c0_5 = arith.constant 0 : index
    %c0_6 = arith.constant 0 : index
    %4 = vector.load %arg4[%c0_4, %c0_5, %c0_6] : memref<1x8x128xf32, #tpu.memory_space<vmem>>, vector<1x8x128xf32>
    %5 = vector.shape_cast %4 : vector<1x8x128xf32> to vector<8x128xf32>
    %6 = vector.shape_cast %3 : vector<8x128xf32> to vector<1x8x128xf32>
    tpu.vector_store %arg4[%c0_4, %c0_5, %c0_6], %6 {strides = array<i32>} : memref<1x8x128xf32, #tpu.memory_space<vmem>>, vector<1x8x128xf32>,
    return
  }
  func.func @transform_0(%arg0: i32, %arg1: i32) -> (i32, i32, i32) {
    %c0_i32 = arith.constant 0 : i32
    %c0_i32_0 = arith.constant 0 : i32
    return %arg1, %arg0, %c0_i32 : i32, i32, i32
  }
  func.func @transform_1(%arg0: i32, %arg1: i32) -> (i32, i32) {
    %c0_i32 = arith.constant 0 : i32
    %c0_i32_0 = arith.constant 0 : i32
    return %arg0, %c0_i32 : i32, i32
  }
  func.func @transform_2(%arg0: i32, %arg1: i32) -> (i32, i32, i32) {
    %c0_i32 = arith.constant 0 : i32
    %c0_i32_0 = arith.constant 0 : i32
    return %arg1, %arg0, %c0_i32 : i32, i32, i32
  }
}

</mosaic_0001>

<bundles_post_ra>
// kernel: tpu_custom_call.1
= control target key start
LH: loop header
LB: loop body
LE: loop exit
PB: predicated region body
PF: predicated region fallthrough
CT: control target
= control target key end

     0   :  { %7 = vsyncpa [#allocation3], 0  ;;  %s714_s0 = inlined_call_operand.hbm [shape: f32[2,8,128], index: 0, kind: input, shape index: {}]   ;;  %s715_s1 = inlined_call_operand.hbm [shape: f32[5000,128], index: 1, kind: input, shape index: {}]   ;;  %s716_s2 = inlined_call_operand.hbm [shape: f32[2,8,128], index: 2, kind: output, shape index: {}]  }
   0x1   :  { %9 = vsyncpa [#allocation3 + $0x1], 0 }
   0x2   :  { %10 = vsyncpa [#allocation6], 0 }
   0x3   :  { %11 = vsyncpa [#allocation4], 0 }
   0x4   :  { %13 = vsyncpa [#allocation4 + $0x1], 0  ;;  %s565_s9 = smov 0   ;;  %s567_s10 = smov 0  }
   0x5   :  { %s569_s11 = smov 0   ;;  %s571_s12 = smov 0  }
   0x6   :  { %s573_s13 = smov 0   ;;  %s575_s14 = smov 0  }
   0x7 LB: > { %s313_s15 = sadd.s32 4294967295, %s547_s14   ;;  %s314_s16 = sadd.s32 4294967294, %s547_s14   ;;  %s547_s14 = sphi %s575_s14, %s19_s14   ;;  %s543_s13 = sphi %s573_s13, %s728_s13   ;;  %s539_s12 = sphi %s571_s12, %s727_s12   ;;  %s535_s11 = sphi %s569_s11, %s726_s11   ;;  %s531_s10 = sphi %s567_s10, %s725_s10   ;;  %s527_s9 = sphi %s565_s9, %s724_s9  }
   0x8   : > { %p53_p0 = scmp.ne.s32.totalorder %s531_s10, %s527_s9  ;;  %p599_p1 = scmp.eq.s32.totalorder %s313_s15, 0 }
   0x9   : > { %p603_p2 = scmp.eq.s32.totalorder %s313_s15, 1  ;;  %p111_p3 = scmp.eq.s32.totalorder %s314_s16, 1 }
   0xa   : > { %p609_p4 = por %p599_p1, %p53_p0  ;;  %p315_p5 = scmp.ge.s32.totalorder %s547_s14, 1 }
   0xb   : > { %p614_p6 = por %p111_p3, %p53_p0  ;;  %p118_p7 = scmp.lt.s32.totalorder %s547_s14, 3 }
   0xc   : > { %s132_s23 = sshll.u32 %s715_s1, 4  ;;  %p317_p9 = scmp.ge.s32.totalorder %s547_s14, 2  ;;  %s133_s23 = int_to_ptr.hbm [resolvable:$true] %s132_s23 }
   0xd   : > { %p622_p8 = pnand %p315_p5, %p118_p7  ;;  %s549_s25 = smov [#allocation5]  }
   0xe   : > { %s134_s26 = sshll.u32 %s549_s25, 4  ;;  %s28_s27 = sadd.s32 1, %s543_s13  ;;  %s135_s26 = int_to_ptr.vmem [resolvable:$true] %s134_s26 }
   0xf   : > { %p336_p10 = pneg %p622_p8  ;;  %p29_p12 = scmp.ge.s32.totalorder %s28_s27, 2 }
  0x10   : > { %s40_s28 = sadd.s32 1, %s535_s11  ;;  %p47_p13 = scmp.ne.s32.totalorder %s535_s11, %s531_s10 }
  0x11   : > { %p337_p11 = pnand %p336_p10, %p599_p1  ;;  %p48_p0 = scmp.eq.s32.totalorder %s547_s14, 0 }
  0x12   : > { %s730_s27 = smov (%p29_p12, %s28_s27), 0  ;;  %p644_p5 = por %p603_p2, %p47_p13 }
  0x13   : > { %339 = dma.hbm_to_vmem [thread:$0]  (!%p337_p11), %s133_s23, 128, %s135_s26, [#allocation6]  }
  0x14   : > { %p638_p3 = por %p48_p0, %p47_p13  ;;  %s35_s3 = ssub.s32 %s543_s13, %s730_s27 }
  0x15   : > { %p349_p7 = scmp.lt.s32.totalorder %s547_s14, 2  ;;  %p38_p10 = scmp.eq.s32.totalorder %s35_s3, 0 }
  0x16   : > { %s145_s4 = sand.u32 1, %s535_s11   ;;  %s319_s7 = sshll.u32 %s543_s13, 3 }
  0x17   : > { %s318_s5 = sshll.u32 %s145_s4, 3  ;;  %s154_s16 = scalar_lea.hbm %s714_s0, %s319_s7 }
  0x18   : > { %s653_s6 = scalar_select %p38_p10, %s535_s11, %s40_s28  }
  0x19   : > { %s149_s21 = scalar_lea.vmem [#allocation2], %s318_s5  ;;  %s156_s18 = sshll.u32 %s154_s16, 4  ;;  %s157_s18 = int_to_ptr.hbm [resolvable:$true] %s156_s18 }
  0x1a   : > { %s158_s22 = sshll.u32 %s149_s21, 4  ;;  %p341_p2 = pnand %p349_p7, %p638_p3  ;;  %s159_s22 = int_to_ptr.vmem [resolvable:$true] %s158_s22 }
  0x1b   : > { %s146_s23 = scalar_lea.sflag [#allocation3], %s145_s4  ;;  %167 = sbr.rel (%p622_p8) target bundleno = 50 (0x32), region = 28 }
  0x1c   : > { %343 = dma.hbm_to_vmem [thread:$0]  (!%p341_p2), %s157_s18, 128, %s159_s22, %s146_s23  }
  0x1d   : > { %s664_s25 = sand.u32 (!%p622_p8), 1, %s531_s10  }
  0x1e   : > { %s321_s26 = sshll.u32 (!%p622_p8), %s664_s25, 3  ;;  %s170_s28 = scalar_lea.sflag (!%p622_p8), [#allocation3], %s664_s25 }
  0x1f   : > { %s173_s3 = scalar_lea.vmem (!%p622_p8), [#allocation2], %s321_s26 }
  0x20   : > { %514 = dma.done.wait (%p609_p4), %s170_s28, 128  }
  0x21   : > { %516 = vsyncadd (%p609_p4), %s170_s28, 4294967168 }
  0x22   : > { %518 = dma.done.wait (%p599_p1), [#allocation6], 128  }
  0x23   : > { %520 = vsyncadd (%p599_p1), [#allocation6], 4294967168  ;;  %s325_s24 = sshll.u32 %s539_s12, 3  ;;  %s199_s7 = scalar_lea.vmem [#allocation7], %s321_s26  ;;  %v200_v0 = vld [vmem:[%s173_s3] sm:$0xff]  ;;  %v201_v1 = vld [vmem:[#allocation5] sm:$0xff] }
  0x24   : > { %s216_s5 = scalar_lea.hbm %s716_s2, %s325_s24  ;;  %s218_s8 = sshll.u32 %s199_s7, 4  ;;  %v202_v2 = vadd.f32 %v201_v1, %v200_v0  ;;  %s219_s8 = int_to_ptr.vmem [resolvable:$true] %s218_s8 }
  0x25   : > { %s220_s15 = sshll.u32 %s216_s5, 4  ;;  %s205_s19 = scalar_lea.sflag [#allocation4], %s664_s25  ;;  %s221_s15 = int_to_ptr.hbm [resolvable:$true] %s220_s15 }
  0x26   : > { %203 = vst [vmem:[%s199_s7] sm:$0xff] %v202_v2  ;;  %s475_s17 = sshra.s32 %s221_s15, 4  ;;  %s481_s22 = scalar_lea.hbm %s716_s2, 16  ;;  %s476_s17 = int_to_ptr.hbm [resolvable:$true] %s475_s17 }
  0x27   : > { %s477_s16 = scalar_lea.hbm %s476_s17, 8  ;;  %p482_p11 = scmp.lt.s32.totalorder %s476_s17, %s716_s2 }
  0x28   : > { %p478_p1 = scmp.ne.s32.totalorder %s476_s17, %s477_s16  ;;  %p483_p12 = scmp.lt.s32.totalorder %s481_s22, %s477_s16 }
  0x2a   : > { %p479_p4 = pnand %p478_p1, %p644_p5  ;;  %p484_p13 = por %p483_p12, %p482_p11 }
  0x2c   : > { %p480_p8 = pneg %p479_p4 }
  0x2e   : > { %p485_p0 = pnand %p484_p13, %p480_p8 }
  0x30   : > { %488 = shalt.err (!%p485_p0)
}
  0x31   : > { %334 = dma.vmem_to_hbm [thread:$0]  (%p644_p5), %s219_s8, 128, %s221_s15, %s205_s19  }
  0x32 PF: > { %s232_s25 = sand.u32 1, %s527_s9   ;;  %p345_p3 = pnand %p317_p9, %p614_p6 }
  0x33   : > { %s233_s26 = scalar_lea.sflag [#allocation4], %s232_s25 }
  0x34   : > { %p346_p7 = pneg %p345_p3 }
  0x36   : > { %522 = dma.done.wait (%p346_p7), %s233_s26, 128  }
  0x37   : > { %524 = vsyncadd (%p346_p7), %s233_s26, 4294967168  ;;  %s19_s14 = sadd.s32 1, %s547_s14   ;;  %s724_s9 = smov %s531_s10 }
  0x38   : > { %p16_p10 = scmp.ge.s32.totalorder %s19_s14, 4   ;;  %s725_s10 = smov %s535_s11 }
  0x39   : > { %s726_s11 = smov %s653_s6  ;;  %s727_s12 = smov %s543_s13 }
  0x3a   : > { %s728_s13 = smov %s730_s27  ;;  %18 = sbr.rel (!%p16_p10) target bundleno = 7 (0x7), region = 78 }
  0x3f   :  { %239 = vsyncpa [#allocation3], 1 }
  0x40   :  { %241 = vsyncpa [#allocation3 + $0x1], 1 }
  0x41   :  { %242 = vsyncpa [#allocation6], 1 }
  0x42   :  { %243 = vsyncpa [#allocation4], 1 }
  0x43   :  { %245 = vsyncpa [#allocation4 + $0x1], 1 }

</bundles_post_ra>
